<compile_context>
chip_gen: v7x
topology: tpu7x:2x2x1
jax: 0.10.0
libtpu: 0.0.40
codegen_flags: <defaults>
</compile_context>

<pallas_src>
import functools

import jax
import jax.numpy as jnp
from jax import lax
from jax.experimental import pallas as pl
from jax.experimental.pallas import tpu as pltpu


def _hardswish(x):
    # PyTorch nn.Hardswish: x * relu6(x + 3) / 6
    return x * jnp.clip(x + 3.0, 0.0, 6.0) * (1.0 / 6.0)


def _resblocks_kernel(C, x_ref, dww_ref, dwb_ref, pw_ref, pwb_ref, o_ref, xp_ref):
    # x_ref  : (Nb, H, WC)      image block, lane-fused layout (WC = W*C)
    # dww_ref: (n, 3, 3, WC)    depthwise weights tiled over W, edge-masked per kw
    # dwb_ref: (n, WC)          depthwise bias tiled over W
    # pw_ref : (n, WC, WC)      block-diagonal pointwise weight (W copies of CxC)
    # pwb_ref: (n, WC)          pointwise bias tiled over W
    # xp_ref : (Nb, H+2, WC)    persistent H-padded scratch (VMEM)
    Nb, H, WC = x_ref.shape
    n_blocks = dww_ref.shape[0]

    # Zero the 1-row top/bottom halo of the padded scratch (interior is
    # rewritten every block; the halo stays zero afterwards).
    xp_ref[:, 0:1, :] = jnp.zeros((Nb, 1, WC), jnp.float32)
    xp_ref[:, H + 1:H + 2, :] = jnp.zeros((Nb, 1, WC), jnp.float32)

    # Running activation, kept 2-D (rows, lanes) -- fully lane-dense.
    x = x_ref[...].astype(jnp.float32).reshape(Nb * H, WC)

    # Static unroll: n is small here.
    # TODO(synk): switch to lax.fori_loop over blk (dynamic weight indexing) if n grows large.
    for blk in range(n_blocks):
        # Stage the current activation into the H-padded scratch (interior only).
        xp_ref[:, 1:H + 1, :] = x.reshape(Nb, H, WC)

        # Depthwise 3x3 conv: 9 fully-packed VPU MACs.
        #   kh-shift: static sublane slice of the padded scratch.
        #   kw-shift: lane roll by +-C (XLU); W-edge wrap is zeroed via the
        #             pre-masked fused weights.
        y = jnp.zeros((Nb * H, WC), jnp.float32)
        for kh in range(3):
            xh = xp_ref[:, kh:kh + H, :].reshape(Nb * H, WC)
            y = y + pltpu.roll(xh, C, axis=1) * dww_ref[blk, kh, 0].reshape(1, WC)
            y = y + xh * dww_ref[blk, kh, 1].reshape(1, WC)
            y = y + pltpu.roll(xh, WC - C, axis=1) * dww_ref[blk, kh, 2].reshape(1, WC)
        y = _hardswish(y + dwb_ref[blk].reshape(1, WC))

        # Pointwise 1x1 conv: one (Nb*H, WC) @ (WC, WC) block-diagonal matmul
        # on the MXU, in the same lane layout (no relayout).
        z = jnp.dot(y, pw_ref[blk], preferred_element_type=jnp.float32)
        z = _hardswish(z + pwb_ref[blk].reshape(1, WC))

        x = z + x  # residual add

    o_ref[...] = x.reshape(Nb, H, WC).astype(o_ref.dtype)


def _fuse_params(dww, dwb, pww, pwb, W):
    """Pre-bake parameters into the lane-fused (W*C) layout (pure JAX, once)."""
    n, _, _, C = dww.shape
    WC = W * C
    # Depthwise weights tiled over W:  dww_f[b, kh, kw, w*C + c] = dww[b, kh, kw, c]
    dww_f = jnp.tile(dww[:, :, :, None, :], (1, 1, 1, W, 1)).reshape(n, 3, 3, WC)
    # Fold the zero-padding at the W edges into the weights (kw=0 reads w-1,
    # kw=2 reads w+1 -> those taps must contribute 0 at the border columns).
    w_idx = jnp.arange(WC) // C
    mask_kw0 = (w_idx >= 1).astype(dww.dtype)
    mask_kw2 = (w_idx <= W - 2).astype(dww.dtype)
    dww_f = dww_f.at[:, :, 0, :].multiply(mask_kw0)
    dww_f = dww_f.at[:, :, 2, :].multiply(mask_kw2)
    dwb_f = jnp.tile(dwb, (1, W))                      # (n, WC)
    pwb_f = jnp.tile(pwb, (1, W))                      # (n, WC)
    # Block-diagonal pointwise matrix:  P[b, w*C+i, v*C+o] = eye[w,v] * pww[b,i,o]
    P = jnp.einsum("wv,bio->bwivo", jnp.eye(W, dtype=pww.dtype), pww).reshape(n, WC, WC)
    return dww_f, dwb_f, P, pwb_f


def _pick_block_n(N, H, WC):
    """Images per grid step: amortize step overhead, keep >=2 steps (v7x has
    2 TensorCores) and stay well inside scoped VMEM on every generation."""
    if N <= 1:
        return 1
    budget = 8 * 1024 * 1024                           # conservative per-step block budget
    per_img = 6 * H * WC * 4                           # in/out (double-buffered) + padded scratch
    cap = max(1, budget // per_img)
    for nb in range(min(N // 2, cap), 0, -1):
        if N % nb == 0:
            return nb
    return 1


def resblocks_forward(x_nhwc, dww, dwb, pww, pwb, *, block_n=None):
    N, H, W, C = x_nhwc.shape
    n = dww.shape[0]
    WC = W * C

    dww_f, dwb_f, P, pwb_f = _fuse_params(dww, dwb, pww, pwb, W)
    x_f = x_nhwc.reshape(N, H, WC)                     # lane-fuse W and C (one-time glue)

    Nb = block_n if block_n is not None else _pick_block_n(N, H, WC)
    assert N % Nb == 0, "batch must be divisible by the per-step image block"

    out = pl.pallas_call(
        functools.partial(_resblocks_kernel, C),
        out_shape=jax.ShapeDtypeStruct((N, H, WC), x_nhwc.dtype),
        grid_spec=pltpu.PrefetchScalarGridSpec(
            num_scalar_prefetch=0,
            grid=(N // Nb,),                           # weights stay VMEM-resident
            in_specs=[
                pl.BlockSpec((Nb, H, WC), lambda b: (b, 0, 0)),
                pl.BlockSpec((n, 3, 3, WC), lambda b: (0, 0, 0, 0)),
                pl.BlockSpec((n, WC), lambda b: (0, 0)),
                pl.BlockSpec((n, WC, WC), lambda b: (0, 0, 0)),
                pl.BlockSpec((n, WC), lambda b: (0, 0)),
            ],
            out_specs=pl.BlockSpec((Nb, H, WC), lambda b: (b, 0, 0)),
            scratch_shapes=[pltpu.VMEM((Nb, H + 2, WC), jnp.float32)],
        ),
        compiler_params=pltpu.CompilerParams(
            dimension_semantics=("parallel",),
            vmem_limit_bytes=32 * 1024 * 1024,
        ),
    )(x_f, dww_f, dwb_f, P, pwb_f)
    return out.reshape(N, H, W, C)


def reference(x_nhwc, dww, dwb, pww, pwb):
    """Pure-JAX reference using lax.conv_general_dilated (matches torch semantics)."""
    n = dww.shape[0]
    C = x_nhwc.shape[-1]
    x = x_nhwc
    for blk in range(n):
        resid = x
        dw_kernel = dww[blk].reshape(3, 3, 1, C)          # HWIO, depthwise (I=1)
        y = lax.conv_general_dilated(
            x, dw_kernel, window_strides=(1, 1), padding="SAME",
            dimension_numbers=("NHWC", "HWIO", "NHWC"),
            feature_group_count=C) + dwb[blk]
        y = _hardswish(y)
        pw_kernel = pww[blk].reshape(1, 1, C, C)          # HWIO, 1x1
        y = lax.conv_general_dilated(
            y, pw_kernel, window_strides=(1, 1), padding="VALID",
            dimension_numbers=("NHWC", "HWIO", "NHWC")) + pwb[blk]
        y = _hardswish(y)
        x = y + resid
    return x


if __name__ == "__main__":
    # torch-equivalent input: NCHW (N, C, H, W); ResBlocks(c=C, n=n_blocks)
    N, C, H, W = 2, 8, 16, 16                            # W*C = 128 -> exactly lane-dense
    n_blocks = 2

    key = jax.random.PRNGKey(0)
    ks = jax.random.split(key, 5)
    x_nchw = jax.random.normal(ks[0], (N, C, H, W), jnp.float32)
    # synthetic parameters (shapes follow the torch __init__)
    dww = 0.3 * jax.random.normal(ks[1], (n_blocks, 3, 3, C), jnp.float32)  # conv1.weight[c,0,kh,kw]
    dwb = 0.1 * jax.random.normal(ks[2], (n_blocks, C), jnp.float32)        # conv1.bias
    pww = 0.3 * jax.random.normal(ks[3], (n_blocks, C, C), jnp.float32)     # conv2.weight[o,i,0,0].T
    pwb = 0.1 * jax.random.normal(ks[4], (n_blocks, C), jnp.float32)        # conv2.bias

    x_nhwc = jnp.transpose(x_nchw, (0, 2, 3, 1))        # layout glue: NCHW -> NHWC

    out = jax.block_until_ready(resblocks_forward(x_nhwc, dww, dwb, pww, pwb))
    ref = reference(x_nhwc, dww, dwb, pww, pwb)
    max_err = float(jnp.max(jnp.abs(out - ref)))
    assert jnp.allclose(out, ref, atol=5e-4, rtol=5e-4), f"mismatch, max_err={max_err}"
    print("KERNEL_OK")
</pallas_src>

<mosaic_0001>
module attributes {stable_mosaic.version = 11 : i64} {
  func.func @_resblocks_kernel(%arg0: i32, %arg1: memref<1x16x128xf32, #tpu.memory_space<vmem>>, %arg2: memref<2x3x3x128xf32, #tpu.memory_space<vmem>>, %arg3: memref<2x128xf32, #tpu.memory_space<vmem>>, %arg4: memref<2x128x128xf32, #tpu.memory_space<vmem>>, %arg5: memref<2x128xf32, #tpu.memory_space<vmem>>, %arg6: memref<1x16x128xf32, #tpu.memory_space<vmem>>, %arg7: memref<1x18x128xf32, #tpu.memory_space<vmem>>) attributes {dimension_semantics = [#tpu.dimension_semantics<parallel>], iteration_bounds = array<i64: 2>, scalar_prefetch = 0 : i64, scratch_operands = 1 : i64, tpu.core_type = #tpu.core_type<tc>, window_params = [{transform_indices = @transform_0, window_bounds = array<i64: 1, 16, 128>}, {pipeline_mode = #tpu.pipeline_mode<synchronous>, transform_indices = @transform_1, window_bounds = array<i64: 2, 3, 3, 128>}, {pipeline_mode = #tpu.pipeline_mode<synchronous>, transform_indices = @transform_2, window_bounds = array<i64: 2, 128>}, {pipeline_mode = #tpu.pipeline_mode<synchronous>, transform_indices = @transform_3, window_bounds = array<i64: 2, 128, 128>}, {pipeline_mode = #tpu.pipeline_mode<synchronous>, transform_indices = @transform_4, window_bounds = array<i64: 2, 128>}, {transform_indices = @transform_5, window_bounds = array<i64: 1, 16, 128>}]} {
    %cst = arith.constant 0.000000e+00 : f32
    %0 = vector.broadcast %cst : f32 to vector<1x1x128xf32>
    %c0 = arith.constant 0 : index
    %c0_0 = arith.constant 0 : index
    %c0_1 = arith.constant 0 : index
    %1 = vector.load %arg7[%c0, %c0_0, %c0_1] : memref<1x18x128xf32, #tpu.memory_space<vmem>>, vector<1x1x128xf32>
    tpu.vector_store %arg7[%c0, %c0_0, %c0_1], %0 {strides = array<i32>} : memref<1x18x128xf32, #tpu.memory_space<vmem>>, vector<1x1x128xf32>,
    %cst_2 = arith.constant 0.000000e+00 : f32
    %2 = vector.broadcast %cst_2 : f32 to vector<1x1x128xf32>
    %c0_3 = arith.constant 0 : index
    %c17 = arith.constant 17 : index
    %c0_4 = arith.constant 0 : index
    %3 = vector.load %arg7[%c0_3, %c17, %c0_4] : memref<1x18x128xf32, #tpu.memory_space<vmem>>, vector<1x1x128xf32>
    tpu.vector_store %arg7[%c0_3, %c17, %c0_4], %2 {strides = array<i32>} : memref<1x18x128xf32, #tpu.memory_space<vmem>>, vector<1x1x128xf32>,
    %c0_5 = arith.constant 0 : index
    %c0_6 = arith.constant 0 : index
    %c0_7 = arith.constant 0 : index
    %4 = vector.load %arg1[%c0_5, %c0_6, %c0_7] : memref<1x16x128xf32, #tpu.memory_space<vmem>>, vector<1x16x128xf32>
    %5 = vector.shape_cast %4 : vector<1x16x128xf32> to vector<16x128xf32>
    %6 = vector.shape_cast %5 : vector<16x128xf32> to vector<1x16x128xf32>
    %c0_8 = arith.constant 0 : index
    %c1 = arith.constant 1 : index
    %c0_9 = arith.constant 0 : index
    %7 = vector.load %arg7[%c0_8, %c1, %c0_9] : memref<1x18x128xf32, #tpu.memory_space<vmem>>, vector<1x16x128xf32>
    tpu.vector_store %arg7[%c0_8, %c1, %c0_9], %6 {strides = array<i32>} : memref<1x18x128xf32, #tpu.memory_space<vmem>>, vector<1x16x128xf32>,
    %cst_10 = arith.constant 0.000000e+00 : f32
    %8 = vector.broadcast %cst_10 : f32 to vector<16x128xf32>
    %c0_11 = arith.constant 0 : index
    %c0_12 = arith.constant 0 : index
    %c0_13 = arith.constant 0 : index
    %9 = vector.load %arg7[%c0_11, %c0_12, %c0_13] : memref<1x18x128xf32, #tpu.memory_space<vmem>>, vector<1x16x128xf32>
    %10 = vector.shape_cast %9 : vector<1x16x128xf32> to vector<16x128xf32>
    %c8_i32 = arith.constant 8 : i32
    %11 = tpu.dynamic_rotate %10 by %c8_i32 dim 1 : vector<16x128xf32>, i32 -> vector<16x128xf32>
    %c0_14 = arith.constant 0 : index
    %c0_15 = arith.constant 0 : index
    %c0_16 = arith.constant 0 : index
    %c0_17 = arith.constant 0 : index
    %12 = vector.load %arg2[%c0_14, %c0_15, %c0_16, %c0_17] : memref<2x3x3x128xf32, #tpu.memory_space<vmem>>, vector<1x1x1x128xf32>
    %13 = vector.shape_cast %12 : vector<1x1x1x128xf32> to vector<128xf32>
    %14 = vector.shape_cast %13 : vector<128xf32> to vector<1x128xf32>
    %15 = vector.broadcast %14 : vector<1x128xf32> to vector<16x128xf32>
    %16 = arith.mulf %11, %15 : vector<16x128xf32>
    %17 = arith.addf %8, %16 : vector<16x128xf32>
    %c0_18 = arith.constant 0 : index
    %c0_19 = arith.constant 0 : index
    %c1_20 = arith.constant 1 : index
    %c0_21 = arith.constant 0 : index
    %18 = vector.load %arg2[%c0_18, %c0_19, %c1_20, %c0_21] : memref<2x3x3x128xf32, #tpu.memory_space<vmem>>, vector<1x1x1x128xf32>
    %19 = vector.shape_cast %18 : vector<1x1x1x128xf32> to vector<128xf32>
    %20 = vector.shape_cast %19 : vector<128xf32> to vector<1x128xf32>
    %21 = vector.broadcast %20 : vector<1x128xf32> to vector<16x128xf32>
    %22 = arith.mulf %10, %21 : vector<16x128xf32>
    %23 = arith.addf %17, %22 : vector<16x128xf32>
    %c120_i32 = arith.constant 120 : i32
    %24 = tpu.dynamic_rotate %10 by %c120_i32 dim 1 : vector<16x128xf32>, i32 -> vector<16x128xf32>
    %c0_22 = arith.constant 0 : index
    %c0_23 = arith.constant 0 : index
    %c2 = arith.constant 2 : index
    %c0_24 = arith.constant 0 : index
    %25 = vector.load %arg2[%c0_22, %c0_23, %c2, %c0_24] : memref<2x3x3x128xf32, #tpu.memory_space<vmem>>, vector<1x1x1x128xf32>
    %26 = vector.shape_cast %25 : vector<1x1x1x128xf32> to vector<128xf32>
    %27 = vector.shape_cast %26 : vector<128xf32> to vector<1x128xf32>
    %28 = vector.broadcast %27 : vector<1x128xf32> to vector<16x128xf32>
    %29 = arith.mulf %24, %28 : vector<16x128xf32>
    %30 = arith.addf %23, %29 : vector<16x128xf32>
    %c0_25 = arith.constant 0 : index
    %c1_26 = arith.constant 1 : index
    %c0_27 = arith.constant 0 : index
    %31 = vector.load %arg7[%c0_25, %c1_26, %c0_27] : memref<1x18x128xf32, #tpu.memory_space<vmem>>, vector<1x16x128xf32>
    %32 = vector.shape_cast %31 : vector<1x16x128xf32> to vector<16x128xf32>
    %c8_i32_28 = arith.constant 8 : i32
    %33 = tpu.dynamic_rotate %32 by %c8_i32_28 dim 1 : vector<16x128xf32>, i32 -> vector<16x128xf32>
    %c0_29 = arith.constant 0 : index
    %c1_30 = arith.constant 1 : index
    %c0_31 = arith.constant 0 : index
    %c0_32 = arith.constant 0 : index
    %34 = vector.load %arg2[%c0_29, %c1_30, %c0_31, %c0_32] : memref<2x3x3x128xf32, #tpu.memory_space<vmem>>, vector<1x1x1x128xf32>
    %35 = vector.shape_cast %34 : vector<1x1x1x128xf32> to vector<128xf32>
    %36 = vector.shape_cast %35 : vector<128xf32> to vector<1x128xf32>
    %37 = vector.broadcast %36 : vector<1x128xf32> to vector<16x128xf32>
    %38 = arith.mulf %33, %37 : vector<16x128xf32>
    %39 = arith.addf %30, %38 : vector<16x128xf32>
    %c0_33 = arith.constant 0 : index
    %c1_34 = arith.constant 1 : index
    %c1_35 = arith.constant 1 : index
    %c0_36 = arith.constant 0 : index
    %40 = vector.load %arg2[%c0_33, %c1_34, %c1_35, %c0_36] : memref<2x3x3x128xf32, #tpu.memory_space<vmem>>, vector<1x1x1x128xf32>
    %41 = vector.shape_cast %40 : vector<1x1x1x128xf32> to vector<128xf32>
    %42 = vector.shape_cast %41 : vector<128xf32> to vector<1x128xf32>
    %43 = vector.broadcast %42 : vector<1x128xf32> to vector<16x128xf32>
    %44 = arith.mulf %32, %43 : vector<16x128xf32>
    %45 = arith.addf %39, %44 : vector<16x128xf32>
    %c120_i32_37 = arith.constant 120 : i32
    %46 = tpu.dynamic_rotate %32 by %c120_i32_37 dim 1 : vector<16x128xf32>, i32 -> vector<16x128xf32>
    %c0_38 = arith.constant 0 : index
    %c1_39 = arith.constant 1 : index
    %c2_40 = arith.constant 2 : index
    %c0_41 = arith.constant 0 : index
    %47 = vector.load %arg2[%c0_38, %c1_39, %c2_40, %c0_41] : memref<2x3x3x128xf32, #tpu.memory_space<vmem>>, vector<1x1x1x128xf32>
    %48 = vector.shape_cast %47 : vector<1x1x1x128xf32> to vector<128xf32>
    %49 = vector.shape_cast %48 : vector<128xf32> to vector<1x128xf32>
    %50 = vector.broadcast %49 : vector<1x128xf32> to vector<16x128xf32>
    %51 = arith.mulf %46, %50 : vector<16x128xf32>
    %52 = arith.addf %45, %51 : vector<16x128xf32>
    %c0_42 = arith.constant 0 : index
    %c2_43 = arith.constant 2 : index
    %c0_44 = arith.constant 0 : index
    %53 = vector.load %arg7[%c0_42, %c2_43, %c0_44] : memref<1x18x128xf32, #tpu.memory_space<vmem>>, vector<1x16x128xf32>
    %54 = vector.shape_cast %53 : vector<1x16x128xf32> to vector<16x128xf32>
    %c8_i32_45 = arith.constant 8 : i32
    %55 = tpu.dynamic_rotate %54 by %c8_i32_45 dim 1 : vector<16x128xf32>, i32 -> vector<16x128xf32>
    %c0_46 = arith.constant 0 : index
    %c2_47 = arith.constant 2 : index
    %c0_48 = arith.constant 0 : index
    %c0_49 = arith.constant 0 : index
    %56 = vector.load %arg2[%c0_46, %c2_47, %c0_48, %c0_49] : memref<2x3x3x128xf32, #tpu.memory_space<vmem>>, vector<1x1x1x128xf32>
    %57 = vector.shape_cast %56 : vector<1x1x1x128xf32> to vector<128xf32>
    %58 = vector.shape_cast %57 : vector<128xf32> to vector<1x128xf32>
    %59 = vector.broadcast %58 : vector<1x128xf32> to vector<16x128xf32>
    %60 = arith.mulf %55, %59 : vector<16x128xf32>
    %61 = arith.addf %52, %60 : vector<16x128xf32>
    %c0_50 = arith.constant 0 : index
    %c2_51 = arith.constant 2 : index
    %c1_52 = arith.constant 1 : index
    %c0_53 = arith.constant 0 : index
    %62 = vector.load %arg2[%c0_50, %c2_51, %c1_52, %c0_53] : memref<2x3x3x128xf32, #tpu.memory_space<vmem>>, vector<1x1x1x128xf32>
    %63 = vector.shape_cast %62 : vector<1x1x1x128xf32> to vector<128xf32>
    %64 = vector.shape_cast %63 : vector<128xf32> to vector<1x128xf32>
    %65 = vector.broadcast %64 : vector<1x128xf32> to vector<16x128xf32>
    %66 = arith.mulf %54, %65 : vector<16x128xf32>
    %67 = arith.addf %61, %66 : vector<16x128xf32>
    %c120_i32_54 = arith.constant 120 : i32
    %68 = tpu.dynamic_rotate %54 by %c120_i32_54 dim 1 : vector<16x128xf32>, i32 -> vector<16x128xf32>
    %c0_55 = arith.constant 0 : index
    %c2_56 = arith.constant 2 : index
    %c2_57 = arith.constant 2 : index
    %c0_58 = arith.constant 0 : index
    %69 = vector.load %arg2[%c0_55, %c2_56, %c2_57, %c0_58] : memref<2x3x3x128xf32, #tpu.memory_space<vmem>>, vector<1x1x1x128xf32>
    %70 = vector.shape_cast %69 : vector<1x1x1x128xf32> to vector<128xf32>
    %71 = vector.shape_cast %70 : vector<128xf32> to vector<1x128xf32>
    %72 = vector.broadcast %71 : vector<1x128xf32> to vector<16x128xf32>
    %73 = arith.mulf %68, %72 : vector<16x128xf32>
    %74 = arith.addf %67, %73 : vector<16x128xf32>
    %c0_59 = arith.constant 0 : index
    %c0_60 = arith.constant 0 : index
    %75 = vector.load %arg3[%c0_59, %c0_60] : memref<2x128xf32, #tpu.memory_space<vmem>>, vector<1x128xf32>
    %76 = vector.shape_cast %75 : vector<1x128xf32> to vector<128xf32>
    %77 = vector.shape_cast %76 : vector<128xf32> to vector<1x128xf32>
    %78 = vector.broadcast %77 : vector<1x128xf32> to vector<16x128xf32>
    %79 = arith.addf %74, %78 : vector<16x128xf32>
    %cst_61 = arith.constant 3.000000e+00 : f32
    %80 = vector.broadcast %cst_61 : f32 to vector<16x128xf32>
    %81 = arith.addf %79, %80 : vector<16x128xf32>
    %cst_62 = arith.constant 0.000000e+00 : f32
    %cst_63 = arith.constant 6.000000e+00 : f32
    %82 = vector.broadcast %cst_62 : f32 to vector<16x128xf32>
    %83 = arith.maximumf %82, %81 : vector<16x128xf32>
    %84 = vector.broadcast %cst_63 : f32 to vector<16x128xf32>
    %85 = arith.minimumf %84, %83 : vector<16x128xf32>
    %86 = arith.mulf %79, %85 : vector<16x128xf32>
    %cst_64 = arith.constant 0.166666672 : f32
    %87 = vector.broadcast %cst_64 : f32 to vector<16x128xf32>
    %88 = arith.mulf %86, %87 : vector<16x128xf32>
    %c0_65 = arith.constant 0 : index
    %c0_66 = arith.constant 0 : index
    %c0_67 = arith.constant 0 : index
    %89 = vector.load %arg4[%c0_65, %c0_66, %c0_67] : memref<2x128x128xf32, #tpu.memory_space<vmem>>, vector<1x128x128xf32>
    %90 = vector.shape_cast %89 : vector<1x128x128xf32> to vector<128x128xf32>
    %cst_68 = arith.constant dense<0.000000e+00> : vector<16x128xf32>
    %91 = tpu.matmul %88, %90, %cst_68 {dimension_numbers = #tpu.dot_dimension_numbers<[1], [0], [0], [1], [0, 0, 1, 1], [], []>} : vector<16x128xf32>, vector<128x128xf32>, vector<16x128xf32> -> vector<16x128xf32>
    %c0_69 = arith.constant 0 : index
    %c0_70 = arith.constant 0 : index
    %92 = vector.load %arg5[%c0_69, %c0_70] : memref<2x128xf32, #tpu.memory_space<vmem>>, vector<1x128xf32>
    %93 = vector.shape_cast %92 : vector<1x128xf32> to vector<128xf32>
    %94 = vector.shape_cast %93 : vector<128xf32> to vector<1x128xf32>
    %95 = vector.broadcast %94 : vector<1x128xf32> to vector<16x128xf32>
    %96 = arith.addf %91, %95 : vector<16x128xf32>
    %cst_71 = arith.constant 3.000000e+00 : f32
    %97 = vector.broadcast %cst_71 : f32 to vector<16x128xf32>
    %98 = arith.addf %96, %97 : vector<16x128xf32>
    %cst_72 = arith.constant 0.000000e+00 : f32
    %cst_73 = arith.constant 6.000000e+00 : f32
    %99 = vector.broadcast %cst_72 : f32 to vector<16x128xf32>
    %100 = arith.maximumf %99, %98 : vector<16x128xf32>
    %101 = vector.broadcast %cst_73 : f32 to vector<16x128xf32>
    %102 = arith.minimumf %101, %100 : vector<16x128xf32>
    %103 = arith.mulf %96, %102 : vector<16x128xf32>
    %cst_74 = arith.constant 0.166666672 : f32
    %104 = vector.broadcast %cst_74 : f32 to vector<16x128xf32>
    %105 = arith.mulf %103, %104 : vector<16x128xf32>
    %106 = arith.addf %105, %5 : vector<16x128xf32>
    %107 = vector.shape_cast %106 : vector<16x128xf32> to vector<1x16x128xf32>
    %c0_75 = arith.constant 0 : index
    %c1_76 = arith.constant 1 : index
    %c0_77 = arith.constant 0 : index
    %108 = vector.load %arg7[%c0_75, %c1_76, %c0_77] : memref<1x18x128xf32, #tpu.memory_space<vmem>>, vector<1x16x128xf32>
    tpu.vector_store %arg7[%c0_75, %c1_76, %c0_77], %107 {strides = array<i32>} : memref<1x18x128xf32, #tpu.memory_space<vmem>>, vector<1x16x128xf32>,
    %cst_78 = arith.constant 0.000000e+00 : f32
    %109 = vector.broadcast %cst_78 : f32 to vector<16x128xf32>
    %c0_79 = arith.constant 0 : index
    %c0_80 = arith.constant 0 : index
    %c0_81 = arith.constant 0 : index
    %110 = vector.load %arg7[%c0_79, %c0_80, %c0_81] : memref<1x18x128xf32, #tpu.memory_space<vmem>>, vector<1x16x128xf32>
    %111 = vector.shape_cast %110 : vector<1x16x128xf32> to vector<16x128xf32>
    %c8_i32_82 = arith.constant 8 : i32
    %112 = tpu.dynamic_rotate %111 by %c8_i32_82 dim 1 : vector<16x128xf32>, i32 -> vector<16x128xf32>
    %c1_83 = arith.constant 1 : index
    %c0_84 = arith.constant 0 : index
    %c0_85 = arith.constant 0 : index
    %c0_86 = arith.constant 0 : index
    %113 = vector.load %arg2[%c1_83, %c0_84, %c0_85, %c0_86] : memref<2x3x3x128xf32, #tpu.memory_space<vmem>>, vector<1x1x1x128xf32>
    %114 = vector.shape_cast %113 : vector<1x1x1x128xf32> to vector<128xf32>
    %115 = vector.shape_cast %114 : vector<128xf32> to vector<1x128xf32>
    %116 = vector.broadcast %115 : vector<1x128xf32> to vector<16x128xf32>
    %117 = arith.mulf %112, %116 : vector<16x128xf32>
    %118 = arith.addf %109, %117 : vector<16x128xf32>
    %c1_87 = arith.constant 1 : index
    %c0_88 = arith.constant 0 : index
    %c1_89 = arith.constant 1 : index
    %c0_90 = arith.constant 0 : index
    %119 = vector.load %arg2[%c1_87, %c0_88, %c1_89, %c0_90] : memref<2x3x3x128xf32, #tpu.memory_space<vmem>>, vector<1x1x1x128xf32>
    %120 = vector.shape_cast %119 : vector<1x1x1x128xf32> to vector<128xf32>
    %121 = vector.shape_cast %120 : vector<128xf32> to vector<1x128xf32>
    %122 = vector.broadcast %121 : vector<1x128xf32> to vector<16x128xf32>
    %123 = arith.mulf %111, %122 : vector<16x128xf32>
    %124 = arith.addf %118, %123 : vector<16x128xf32>
    %c120_i32_91 = arith.constant 120 : i32
    %125 = tpu.dynamic_rotate %111 by %c120_i32_91 dim 1 : vector<16x128xf32>, i32 -> vector<16x128xf32>
    %c1_92 = arith.constant 1 : index
    %c0_93 = arith.constant 0 : index
    %c2_94 = arith.constant 2 : index
    %c0_95 = arith.constant 0 : index
    %126 = vector.load %arg2[%c1_92, %c0_93, %c2_94, %c0_95] : memref<2x3x3x128xf32, #tpu.memory_space<vmem>>, vector<1x1x1x128xf32>
    %127 = vector.shape_cast %126 : vector<1x1x1x128xf32> to vector<128xf32>
    %128 = vector.shape_cast %127 : vector<128xf32> to vector<1x128xf32>
    %129 = vector.broadcast %128 : vector<1x128xf32> to vector<16x128xf32>
    %130 = arith.mulf %125, %129 : vector<16x128xf32>
    %131 = arith.addf %124, %130 : vector<16x128xf32>
    %c0_96 = arith.constant 0 : index
    %c1_97 = arith.constant 1 : index
    %c0_98 = arith.constant 0 : index
    %132 = vector.load %arg7[%c0_96, %c1_97, %c0_98] : memref<1x18x128xf32, #tpu.memory_space<vmem>>, vector<1x16x128xf32>
    %133 = vector.shape_cast %132 : vector<1x16x128xf32> to vector<16x128xf32>
    %c8_i32_99 = arith.constant 8 : i32
    %134 = tpu.dynamic_rotate %133 by %c8_i32_99 dim 1 : vector<16x128xf32>, i32 -> vector<16x128xf32>
    %c1_100 = arith.constant 1 : index
    %c1_101 = arith.constant 1 : index
    %c0_102 = arith.constant 0 : index
    %c0_103 = arith.constant 0 : index
    %135 = vector.load %arg2[%c1_100, %c1_101, %c0_102, %c0_103] : memref<2x3x3x128xf32, #tpu.memory_space<vmem>>, vector<1x1x1x128xf32>
    %136 = vector.shape_cast %135 : vector<1x1x1x128xf32> to vector<128xf32>
    %137 = vector.shape_cast %136 : vector<128xf32> to vector<1x128xf32>
    %138 = vector.broadcast %137 : vector<1x128xf32> to vector<16x128xf32>
    %139 = arith.mulf %134, %138 : vector<16x128xf32>
    %140 = arith.addf %131, %139 : vector<16x128xf32>
    %c1_104 = arith.constant 1 : index
    %c1_105 = arith.constant 1 : index
    %c1_106 = arith.constant 1 : index
    %c0_107 = arith.constant 0 : index
    %141 = vector.load %arg2[%c1_104, %c1_105, %c1_106, %c0_107] : memref<2x3x3x128xf32, #tpu.memory_space<vmem>>, vector<1x1x1x128xf32>
    %142 = vector.shape_cast %141 : vector<1x1x1x128xf32> to vector<128xf32>
    %143 = vector.shape_cast %142 : vector<128xf32> to vector<1x128xf32>
    %144 = vector.broadcast %143 : vector<1x128xf32> to vector<16x128xf32>
    %145 = arith.mulf %133, %144 : vector<16x128xf32>
    %146 = arith.addf %140, %145 : vector<16x128xf32>
    %c120_i32_108 = arith.constant 120 : i32
    %147 = tpu.dynamic_rotate %133 by %c120_i32_108 dim 1 : vector<16x128xf32>, i32 -> vector<16x128xf32>
    %c1_109 = arith.constant 1 : index
    %c1_110 = arith.constant 1 : index
    %c2_111 = arith.constant 2 : index
    %c0_112 = arith.constant 0 : index
    %148 = vector.load %arg2[%c1_109, %c1_110, %c2_111, %c0_112] : memref<2x3x3x128xf32, #tpu.memory_space<vmem>>, vector<1x1x1x128xf32>
    %149 = vector.shape_cast %148 : vector<1x1x1x128xf32> to vector<128xf32>
    %150 = vector.shape_cast %149 : vector<128xf32> to vector<1x128xf32>
    %151 = vector.broadcast %150 : vector<1x128xf32> to vector<16x128xf32>
    %152 = arith.mulf %147, %151 : vector<16x128xf32>
    %153 = arith.addf %146, %152 : vector<16x128xf32>
    %c0_113 = arith.constant 0 : index
    %c2_114 = arith.constant 2 : index
    %c0_115 = arith.constant 0 : index
    %154 = vector.load %arg7[%c0_113, %c2_114, %c0_115] : memref<1x18x128xf32, #tpu.memory_space<vmem>>, vector<1x16x128xf32>
    %155 = vector.shape_cast %154 : vector<1x16x128xf32> to vector<16x128xf32>
    %c8_i32_116 = arith.constant 8 : i32
    %156 = tpu.dynamic_rotate %155 by %c8_i32_116 dim 1 : vector<16x128xf32>, i32 -> vector<16x128xf32>
    %c1_117 = arith.constant 1 : index
    %c2_118 = arith.constant 2 : index
    %c0_119 = arith.constant 0 : index
    %c0_120 = arith.constant 0 : index
    %157 = vector.load %arg2[%c1_117, %c2_118, %c0_119, %c0_120] : memref<2x3x3x128xf32, #tpu.memory_space<vmem>>, vector<1x1x1x128xf32>
    %158 = vector.shape_cast %157 : vector<1x1x1x128xf32> to vector<128xf32>
    %159 = vector.shape_cast %158 : vector<128xf32> to vector<1x128xf32>
    %160 = vector.broadcast %159 : vector<1x128xf32> to vector<16x128xf32>
    %161 = arith.mulf %156, %160 : vector<16x128xf32>
    %162 = arith.addf %153, %161 : vector<16x128xf32>
    %c1_121 = arith.constant 1 : index
    %c2_122 = arith.constant 2 : index
    %c1_123 = arith.constant 1 : index
    %c0_124 = arith.constant 0 : index
    %163 = vector.load %arg2[%c1_121, %c2_122, %c1_123, %c0_124] : memref<2x3x3x128xf32, #tpu.memory_space<vmem>>, vector<1x1x1x128xf32>
    %164 = vector.shape_cast %163 : vector<1x1x1x128xf32> to vector<128xf32>
    %165 = vector.shape_cast %164 : vector<128xf32> to vector<1x128xf32>
    %166 = vector.broadcast %165 : vector<1x128xf32> to vector<16x128xf32>
    %167 = arith.mulf %155, %166 : vector<16x128xf32>
    %168 = arith.addf %162, %167 : vector<16x128xf32>
    %c120_i32_125 = arith.constant 120 : i32
    %169 = tpu.dynamic_rotate %155 by %c120_i32_125 dim 1 : vector<16x128xf32>, i32 -> vector<16x128xf32>
    %c1_126 = arith.constant 1 : index
    %c2_127 = arith.constant 2 : index
    %c2_128 = arith.constant 2 : index
    %c0_129 = arith.constant 0 : index
    %170 = vector.load %arg2[%c1_126, %c2_127, %c2_128, %c0_129] : memref<2x3x3x128xf32, #tpu.memory_space<vmem>>, vector<1x1x1x128xf32>
    %171 = vector.shape_cast %170 : vector<1x1x1x128xf32> to vector<128xf32>
    %172 = vector.shape_cast %171 : vector<128xf32> to vector<1x128xf32>
    %173 = vector.broadcast %172 : vector<1x128xf32> to vector<16x128xf32>
    %174 = arith.mulf %169, %173 : vector<16x128xf32>
    %175 = arith.addf %168, %174 : vector<16x128xf32>
    %c1_130 = arith.constant 1 : index
    %c0_131 = arith.constant 0 : index
    %176 = vector.load %arg3[%c1_130, %c0_131] : memref<2x128xf32, #tpu.memory_space<vmem>>, vector<1x128xf32>
    %177 = vector.shape_cast %176 : vector<1x128xf32> to vector<128xf32>
    %178 = vector.shape_cast %177 : vector<128xf32> to vector<1x128xf32>
    %179 = vector.broadcast %178 : vector<1x128xf32> to vector<16x128xf32>
    %180 = arith.addf %175, %179 : vector<16x128xf32>
    %cst_132 = arith.constant 3.000000e+00 : f32
    %181 = vector.broadcast %cst_132 : f32 to vector<16x128xf32>
    %182 = arith.addf %180, %181 : vector<16x128xf32>
    %cst_133 = arith.constant 0.000000e+00 : f32
    %cst_134 = arith.constant 6.000000e+00 : f32
    %183 = vector.broadcast %cst_133 : f32 to vector<16x128xf32>
    %184 = arith.maximumf %183, %182 : vector<16x128xf32>
    %185 = vector.broadcast %cst_134 : f32 to vector<16x128xf32>
    %186 = arith.minimumf %185, %184 : vector<16x128xf32>
    %187 = arith.mulf %180, %186 : vector<16x128xf32>
    %cst_135 = arith.constant 0.166666672 : f32
    %188 = vector.broadcast %cst_135 : f32 to vector<16x128xf32>
    %189 = arith.mulf %187, %188 : vector<16x128xf32>
    %c1_136 = arith.constant 1 : index
    %c0_137 = arith.constant 0 : index
    %c0_138 = arith.constant 0 : index
    %190 = vector.load %arg4[%c1_136, %c0_137, %c0_138] : memref<2x128x128xf32, #tpu.memory_space<vmem>>, vector<1x128x128xf32>
    %191 = vector.shape_cast %190 : vector<1x128x128xf32> to vector<128x128xf32>
    %cst_139 = arith.constant dense<0.000000e+00> : vector<16x128xf32>
    %192 = tpu.matmul %189, %191, %cst_139 {dimension_numbers = #tpu.dot_dimension_numbers<[1], [0], [0], [1], [0, 0, 1, 1], [], []>} : vector<16x128xf32>, vector<128x128xf32>, vector<16x128xf32> -> vector<16x128xf32>
    %c1_140 = arith.constant 1 : index
    %c0_141 = arith.constant 0 : index
    %193 = vector.load %arg5[%c1_140, %c0_141] : memref<2x128xf32, #tpu.memory_space<vmem>>, vector<1x128xf32>
    %194 = vector.shape_cast %193 : vector<1x128xf32> to vector<128xf32>
    %195 = vector.shape_cast %194 : vector<128xf32> to vector<1x128xf32>
    %196 = vector.broadcast %195 : vector<1x128xf32> to vector<16x128xf32>
    %197 = arith.addf %192, %196 : vector<16x128xf32>
    %cst_142 = arith.constant 3.000000e+00 : f32
    %198 = vector.broadcast %cst_142 : f32 to vector<16x128xf32>
    %199 = arith.addf %197, %198 : vector<16x128xf32>
    %cst_143 = arith.constant 0.000000e+00 : f32
    %cst_144 = arith.constant 6.000000e+00 : f32
    %200 = vector.broadcast %cst_143 : f32 to vector<16x128xf32>
    %201 = arith.maximumf %200, %199 : vector<16x128xf32>
    %202 = vector.broadcast %cst_144 : f32 to vector<16x128xf32>
    %203 = arith.minimumf %202, %201 : vector<16x128xf32>
    %204 = arith.mulf %197, %203 : vector<16x128xf32>
    %cst_145 = arith.constant 0.166666672 : f32
    %205 = vector.broadcast %cst_145 : f32 to vector<16x128xf32>
    %206 = arith.mulf %204, %205 : vector<16x128xf32>
    %207 = arith.addf %206, %106 : vector<16x128xf32>
    %208 = vector.shape_cast %207 : vector<16x128xf32> to vector<1x16x128xf32>
    %c0_146 = arith.constant 0 : index
    %c0_147 = arith.constant 0 : index
    %c0_148 = arith.constant 0 : index
    %209 = vector.load %arg6[%c0_146, %c0_147, %c0_148] : memref<1x16x128xf32, #tpu.memory_space<vmem>>, vector<1x16x128xf32>
    tpu.vector_store %arg6[%c0_146, %c0_147, %c0_148], %208 {strides = array<i32>} : memref<1x16x128xf32, #tpu.memory_space<vmem>>, vector<1x16x128xf32>,
    return
  }
  func.func @transform_0(%arg0: i32) -> (i32, i32, i32) {
    %c0_i32 = arith.constant 0 : i32
    %c0_i32_0 = arith.constant 0 : i32
    %c0_i32_1 = arith.constant 0 : i32
    return %arg0, %c0_i32, %c0_i32_0 : i32, i32, i32
  }
  func.func @transform_1(%arg0: i32) -> (i32, i32, i32, i32) {
    %c0_i32 = arith.constant 0 : i32
    %c0_i32_0 = arith.constant 0 : i32
    %c0_i32_1 = arith.constant 0 : i32
    %c0_i32_2 = arith.constant 0 : i32
    %c0_i32_3 = arith.constant 0 : i32
    return %c0_i32, %c0_i32_0, %c0_i32_1, %c0_i32_2 : i32, i32, i32, i32
  }
  func.func @transform_2(%arg0: i32) -> (i32, i32) {
    %c0_i32 = arith.constant 0 : i32
    %c0_i32_0 = arith.constant 0 : i32
    %c0_i32_1 = arith.constant 0 : i32
    return %c0_i32, %c0_i32_0 : i32, i32
  }
  func.func @transform_3(%arg0: i32) -> (i32, i32, i32) {
    %c0_i32 = arith.constant 0 : i32
    %c0_i32_0 = arith.constant 0 : i32
    %c0_i32_1 = arith.constant 0 : i32
    %c0_i32_2 = arith.constant 0 : i32
    return %c0_i32, %c0_i32_0, %c0_i32_1 : i32, i32, i32
  }
  func.func @transform_4(%arg0: i32) -> (i32, i32) {
    %c0_i32 = arith.constant 0 : i32
    %c0_i32_0 = arith.constant 0 : i32
    %c0_i32_1 = arith.constant 0 : i32
    return %c0_i32, %c0_i32_0 : i32, i32
  }
  func.func @transform_5(%arg0: i32) -> (i32, i32, i32) {
    %c0_i32 = arith.constant 0 : i32
    %c0_i32_0 = arith.constant 0 : i32
    %c0_i32_1 = arith.constant 0 : i32
    return %arg0, %c0_i32, %c0_i32_0 : i32, i32, i32
  }
}

</mosaic_0001>

<bundles_post_ra>
// kernel: tpu_custom_call.1
= control target key start
LH: loop header
LB: loop body
LE: loop exit
PB: predicated region body
PF: predicated region fallthrough
CT: control target
= control target key end

     0   :  { %10 = vsyncpa [#allocation4], 0  ;;  %s1484_s0 = inlined_call_operand.vmem [shape: f32[2,16,128], index: 0, kind: input, shape index: {}]   ;;  %s1485_s1 = inlined_call_operand.vmem [shape: f32[2,3,3,128], index: 1, kind: input, shape index: {}]   ;;  %s1486_s2 = inlined_call_operand.vmem [shape: f32[2,128], index: 2, kind: input, shape index: {}]   ;;  %s1487_s3 = inlined_call_operand.hbm [shape: f32[2,128,128], index: 3, kind: input, shape index: {}]   ;;  %s1488_s4 = inlined_call_operand.vmem [shape: f32[2,128], index: 4, kind: input, shape index: {}]   ;;  %s1489_s5 = inlined_call_operand.hbm [shape: f32[2,16,128], index: 5, kind: output, shape index: {}]  }
   0x1   :  { %11 = vsyncpa [#allocation5], 0 }
   0x2   :  { %13 = vsyncpa [#allocation5 + $0x1], 0  ;;  %s1227_s18 = smov 0   ;;  %s1229_s19 = smov 0  }
   0x3   :  { %s1231_s20 = smov 0   ;;  %s1233_s21 = smov 0  }
   0x4 LB: > { %s1248_s22 = sadd.s32 4294967295, %s1187_s21   ;;  %s814_s23 = sadd.s32 4294967294, %s1187_s21   ;;  %s1187_s21 = sphi %s1233_s21, %s1505_s21   ;;  %s1183_s20 = sphi %s1231_s20, %s1504_s20   ;;  %s1179_s19 = sphi %s1229_s19, %s1503_s19   ;;  %s1175_s18 = sphi %s1227_s18, %s1502_s18  }
   0x5   : > { %s1252_s24 = sadd.s32 1, %s1187_s21   ;;  %s136_s25 = sadd.s32 1, %s1183_s20 }
   0x6   : > { %s133_s26 = ssub.s32 %s1187_s21, %s1252_s24  ;;  %p146_p0 = scmp.ne.s32.totalorder %s1183_s20, %s1179_s19 }
   0x7   : > { %p134_p1 = scmp.eq.s32.totalorder %s133_s26, 0  ;;  %p147_p2 = scmp.eq.s32.totalorder %s1248_s22, 1 }
   0x8   : > { %p152_p3 = scmp.ne.s32.totalorder %s1179_s19, %s1175_s18  ;;  %p153_p4 = scmp.eq.s32.totalorder %s814_s23, 1 }
   0x9   : > { %s1263_s27 = scalar_select %p134_p1, %s1183_s20, %s136_s25  }
   0xa   : > { %p1265_p5 = por %p147_p2, %p146_p0  ;;  %p1269_p6 = por %p153_p4, %p152_p3 }
   0xb   : > { %p815_p7 = scmp.ge.s32.totalorder %s1187_s21, 1  ;;  %p160_p8 = scmp.lt.s32.totalorder %s1187_s21, 3 }
   0xc   : > { %s1493_s28 = scalar_select %p1265_p5, 1, 0 }
   0xd   : > { %s1494_s29 = scalar_select %p1269_p6, 1, 0 }
   0xe   : > { %p1490_p9 = scmp.eq.s32.totalorder %s1248_s22, 0  ;;  %p1276_p10 = pnand %p815_p7, %p160_p8 }
   0xf   : > { %s1189_s6 = smov [#allocation3]   ;;  %s1093_s11 = scalar_lea.hbm %s1487_s3, 4096 }
  0x10   : > { %s1495_s30 = scalar_select %p1276_p10, 1, 0 }
  0x11   : > { %s178_s7 = sshll.u32 %s1189_s6, 4  ;;  %p1043_p11 = pneg %p1276_p10  ;;  %s179_s7 = int_to_ptr.vmem [resolvable:$true] %s178_s7 }
  0x12   : > { %p1094_p13 = scmp.ne.s32.totalorder %s1487_s3, %s1093_s11  ;;  %p1100_p3 = scmp.lt.u32.totalorder %s1093_s11, %s1487_s3 }
  0x13   : > { %p1284_p12 = pnand %p1490_p9, %p1043_p11 }
  0x15   : > { %p1095_p0 = pneg %p1284_p12 }
  0x17   : > { %p1096_p1 = pnand %p1095_p0, %p1094_p13 }
  0x19   : > { %p1097_p2 = pneg %p1096_p1 }
  0x1b   : > { %p1102_p4 = pnand %p1100_p3, %p1097_p2 }
  0x1d   : > { %1105 = shalt.err (!%p1102_p4)
}
  0x1e   : > { %s1106_s16 = scalar_lea.vmem %s179_s7, 4096  ;;  %p1114_p9 = scmp.lt.s32.totalorder %s179_s7, %s179_s7 }
  0x1f   : > { %p1107_p7 = scmp.ne.s32.totalorder %s179_s7, %s1106_s16  ;;  %p1115_p6 = scmp.lt.s32.totalorder %s1106_s16, %s1106_s16 }
  0x21   : > { %p1109_p8 = pnand %p1107_p7, %p1095_p0  ;;  %p1116_p5 = por %p1115_p6, %p1114_p9 }
  0x23   : > { %p1110_p11 = pneg %p1109_p8 }
  0x25   : > { %p1117_p10 = pnand %p1116_p5, %p1110_p11 }
  0x27   : > { %1120 = shalt.err (!%p1117_p10)
}
  0x28   : > { %s1190_s17 = smov 128   ;;  %s1191_s23 = smov 8  }
  0x29   : > { %1046 = dma.hbm_to_vmem [thread:$0]  (!%p1284_p12), %s1487_s3, 4096, %s179_s7, [#allocation4], %s1190_s17, %s1190_s17, %s1191_s23  }
  0x2a   : > { %p1497_p13 = scmp.ne.s32.totalorder %s1495_s30, 0 }
  0x2b   : > { %p1498_p1 = scmp.eq.s32.totalorder (!%p1497_p13), %s1248_s22, 0 }
  0x2c   : > { %205 = sbr.rel (%p1497_p13) target bundleno = 848 (0x350), region = 40 }
  0x33   : > { %1166 = dma.done.wait (%p1498_p1), [#allocation4], 4096   ;;  %p1499_p0 = pmov %p1498_p1 }
  0x34   : > { %p233_p5 = scmp.lt.s32.totalorder %s1248_s22, 1  ;;  %v1192_v0 = vmov 0.0   ;;  %v374_v3 = vld [vmem:[#allocation3] sm:$0xff]  ;;  %v375_v4 = vld [vmem:[#allocation3 + $0x8] sm:$0xff]  ;;  %v376_v5 = vld [vmem:[#allocation3 + $0x10] sm:$0xff]  ;;  %s1193_s30 = smov 120  }
  0x35   : > { %1168 = vsyncadd (%p1499_p0), [#allocation4], 4294963200  ;;  %238 = vst [vmem:[#allocation2] sm:$0x1] %v1192_v0  ;;  %v973_v6 = vpack.c.bf16 %v375_v4, %v374_v3  ;;  %v377_v7 = vld [vmem:[#allocation3 + $0x18] sm:$0xff]  ;;  %v378_v9 = vld [vmem:[#allocation3 + $0x20] sm:$0xff] }
  0x36   : > { %239 = vst [vmem:[#allocation2 + $0x11] sm:$0x1] %v1192_v0  ;;  %s234_s6 = scalar_select %p233_p5, %s1248_s22, 1  ;;  %v977_v8 = vpack.c.bf16 %v377_v7, %v376_v5  ;;  %v379_v10 = vld [vmem:[#allocation3 + $0x28] sm:$0xff]  ;;  %v380_v14 = vld [vmem:[#allocation3 + $0x30] sm:$0xff]  ;;  %v381_v15 = vld [vmem:[#allocation3 + $0x38] sm:$0xff] }
  0x37   : > { %974 = vmatprep.subr.bf16.mxu0 %v973_v6  ;;  %v981_v11 = vpack.c.bf16 %v379_v10, %v378_v9  ;;  %s1194_s11 = smov 8   ;;  %v985_v16 = vpack.c.bf16 %v381_v15, %v380_v14  ;;  %v382_v17 = vld [vmem:[#allocation3 + $0x40] sm:$0xff]  ;;  %v383_v18 = vld [vmem:[#allocation3 + $0x48] sm:$0xff]  ;;  %v384_v20 = vld [vmem:[#allocation3 + $0x50] sm:$0xff]  ;;  %s230_s12 = sand.u32 1, %s1179_s19  }
  0x38   : > { %s865_s8 = sshll.u32 %s234_s6, 4  ;;  %976 = vmatpush3.bf16.msra.mxu0 %v973_v6  ;;  %v989_v19 = vpack.c.bf16 %v383_v18, %v382_v17  ;;  %v385_v21 = vld [vmem:[#allocation3 + $0x58] sm:$0xff]  ;;  %v386_v23 = vld [vmem:[#allocation3 + $0x60] sm:$0xff]  ;;  %v387_v24 = vld [vmem:[#allocation3 + $0x68] sm:$0xff]  ;;  %s820_s13 = sshll.u32 %s230_s12, 4 }
  0x39   : > { %s237_s7 = scalar_lea.vmem %s1484_s0, %s865_s8  ;;  %978 = vmatprep.subr.bf16.mxu0 %v977_v8  ;;  %v993_v22 = vpack.c.bf16 %v385_v21, %v384_v20  ;;  %v997_v27 = vpack.c.bf16 %v387_v24, %v386_v23  ;;  %v388_v28 = vld [vmem:[#allocation3 + $0x70] sm:$0xff]  ;;  %v389_v29 = vld [vmem:[#allocation3 + $0x78] sm:$0xff]  ;;  %v823_v31 = vld [vmem:[%s1485_s1] ss:$0 sm:$0xff]  ;;  %s232_s14 = scalar_lea.vmem [#allocation6], %s820_s13 }
  0x3a   : > { %v1315_v1 = vld [vmem:[%s237_s7] sm:$0xff]  ;;  %v1317_v2 = vld [vmem:[%s237_s7 + $0x8] sm:$0xff]  ;;  %v1001_v30 = vpack.c.bf16 %v389_v29, %v388_v28  ;;  %s740_s15 = sshll.u32 %s232_s14, 4  ;;  %s866_s16 = sshll.u32 %s1248_s22, 8  ;;  %s1434_s15 = int_to_ptr.vmem [resolvable:$true] %s740_s15 }
  0x3b   : > { %242 = vst [vmem:[#allocation2 + $0x1] sm:$0xff] %v1315_v1  ;;  %243 = vst [vmem:[#allocation2 + $0x9] sm:$0xff] %v1317_v2  ;;  %v824_v32 = vld [vmem:[%s1485_s1 + $0x1] ss:$0 sm:$0xff]  ;;  %v825_v37 = vld [vmem:[%s1485_s1 + $0x2] ss:$0 sm:$0xff]  ;;  %s1440_s25 = scalar_lea.hbm %s1489_s5, %s866_s16 }
  0x3c   : > { %980 = vmatpush3.bf16.msra.mxu0 %v977_v8  ;;  %v829_v45 = vld [vmem:[%s1485_s1 + $0x5] ss:$0 sm:$0xff]  ;;  %v827_v46 = vld [vmem:[%s1485_s1 + $0x4] ss:$0 sm:$0xff]  ;;  %v831_v56 = vld [vmem:[%s1485_s1 + $0x6] ss:$0 sm:$0xff] }
  0x3d   : > { %982 = vmatprep.subr.bf16.mxu0 %v981_v11  ;;  %v303_v50 = vmul.f32 %v829_v45, %v1317_v2  ;;  %v302_v51 = vmul.f32 %v829_v45, %v1315_v1  ;;  %v835_v3 = vld [vmem:[%s1485_s1 + $0x9] ss:$0 sm:$0xff]  ;;  %v833_v4 = vld [vmem:[%s1485_s1 + $0x8] ss:$0 sm:$0xff]  ;;  %s1442_s26 = scalar_lea.sflag [#allocation5], %s230_s12  ;;  %s1121_s22 = scalar_lea.vmem %s1434_s15, 256 }
  0x3e   : > { %p1122_p6 = scmp.ne.s32.totalorder %s1434_s15, %s1121_s22  ;;  %p1500_p9 = scmp.ne.s32.totalorder %s1493_s28, 0 }
  0x3f   : > { %s1195_s6 = smov [#allocation6]  }
  0x40   : > { %984 = vmatpush3.bf16.msra.mxu0 %v981_v11  ;;  %p1123_p10 = pnand %p1122_p6, %p1500_p9  ;;  %s1125_s8 = sshll.u32 %s1195_s6, 4  ;;  %s1126_s8 = int_to_ptr.vmem [resolvable:$false] %s1125_s8 }
  0x41   : > { %986 = vmatprep.subr.bf16.mxu0 %v985_v16  ;;  %s1127_s9 = scalar_lea.vmem %s1126_s8, 512  ;;  %p1128_p2 = scmp.lt.s32.totalorder %s1434_s15, %s1126_s8 }
  0x42   : > { %v244_v12 = vld [vmem:[#allocation2] sm:$0xff]  ;;  %v245_v13 = vld [vmem:[#allocation2 + $0x8] sm:$0xff]  ;;  %p1124_p12 = pneg %p1123_p10  ;;  %p1129_p3 = scmp.lt.s32.totalorder %s1127_s9, %s1121_s22 }
  0x43   : > { %268 = vrot.lane.b32.xlu1 %v244_v12, %s1193_s30  ;;  %246 = vrot.lane.b32.xlu0 %v244_v12, %s1194_s11  ;;  %v320_v25 = vld [vmem:[#allocation2 + $0xa] sm:$0xff]  ;;  %v319_v26 = vld [vmem:[#allocation2 + $0x2] sm:$0xff]  ;;  %v264_v36 = vmul.f32 %v824_v32, %v244_v12  ;;  %v265_v38 = vmul.f32 %v824_v32, %v245_v13 }
  0x44   : > { %988 = vmatpush3.bf16.msra.mxu0 %v985_v16  ;;  %v341_v7 = vmul.f32 %v835_v3, %v320_v25  ;;  %v340_v8 = vmul.f32 %v835_v3, %v319_v26  ;;  %p1130_p4 = por %p1129_p3, %p1128_p2 }
  0x45   : > { %990 = vmatprep.subr.bf16.mxu0 %v989_v19 }
  0x46   : > { %p1131_p7 = pnand %p1130_p4, %p1124_p12 }
  0x47   : > { %270 = vrot.lane.b32.xlu1 %v245_v13, %s1193_s30  ;;  %248 = vrot.lane.b32.xlu0 %v245_v13, %s1194_s11  ;;  %v837_v13 = vld [vmem:[%s1485_s1 + $0xa] ss:$0 sm:$0xff] }
  0x48   : > { %992 = vmatpush3.bf16.msra.mxu0 %v989_v19 }
  0x49   : > { %994 = vmatprep.subr.bf16.mxu0 %v993_v22 }
  0x4b   : > { %285 = vrot.lane.b32.xlu1 %v1317_v2, %s1194_s11  ;;  %283 = vrot.lane.b32.xlu0 %v1315_v1, %s1194_s11 }
  0x4c   : > { %996 = vmatpush3.bf16.msra.mxu0 %v993_v22  ;;  %v838_v22 = vld [vmem:[%s1486_s2] ss:$0 sm:$0xff] }
  0x4d   : > { %998 = vmatprep.subr.bf16.mxu0 %v997_v27 }
  0x4f   : > { %308 = vrot.lane.b32.xlu1 %v1317_v2, %s1193_s30  ;;  %306 = vrot.lane.b32.xlu0 %v1315_v1, %s1193_s30 }
  0x50   : > { %1000 = vmatpush3.bf16.msra.mxu0 %v997_v27 }
  0x51   : > { %1002 = vmatprep.subr.bf16.mxu0 %v1001_v30 }
  0x53   : > { %323 = vrot.lane.b32.xlu1 %v320_v25, %s1194_s11  ;;  %321 = vrot.lane.b32.xlu0 %v319_v26, %s1194_s11 }
  0x54   : > { %1004 = vmatpush3.bf16.msra.mxu0 %v1001_v30 }
  0x57   : > { %346 = vrot.lane.b32.xlu1 %v320_v25, %s1193_s30  ;;  %344 = vrot.lane.b32.xlu0 %v319_v26, %s1193_s30 }
  0xb5   : > { %v269_v33 = vpop.permute.xlu1 %268  ;;  %v247_v34 = vpop.permute.xlu0 %246 }
  0xb6   : > { %v255_v35 = vmul.f32 %v823_v31, %v247_v34  ;;  %v277_v41 = vmul.f32 %v825_v37, %v269_v33 }
  0xb8   : > { %v266_v42 = vadd.f32 %v264_v36, %v255_v35 }
  0xb9   : > { %v271_v39 = vpop.permute.xlu1 %270  ;;  %v249_v40 = vpop.permute.xlu0 %248 }
  0xba   : > { %v278_v43 = vmul.f32 %v825_v37, %v271_v39  ;;  %v256_v44 = vmul.f32 %v823_v31, %v249_v40  ;;  %v279_v54 = vadd.f32 %v277_v41, %v266_v42  ;;  %v839_v37 = vld [vmem:[%s1488_s4] ss:$0 sm:$0xff] }
  0xbc   : > { %v267_v47 = vadd.f32 %v265_v38, %v256_v44 }
  0xbd   : > { %v286_v48 = vpop.permute.xlu1 %285  ;;  %v284_v49 = vpop.permute.xlu0 %283 }
  0xbe   : > { %v280_v52 = vadd.f32 %v278_v43, %v267_v47  ;;  %v294_v53 = vmul.f32 %v827_v46, %v286_v48  ;;  %v293_v55 = vmul.f32 %v827_v46, %v284_v49 }
  0xc0   : > { %v296_v57 = vadd.f32 %v294_v53, %v280_v52  ;;  %v295_v58 = vadd.f32 %v293_v55, %v279_v54  ;;  %v616_v53 = vld [vmem:[#allocation3 + $0x80] sm:$0xff]  ;;  %v617_v54 = vld [vmem:[#allocation3 + $0x88] sm:$0xff] }
  0xc1   : > { %v309_v59 = vpop.permute.xlu1 %308  ;;  %v307_v60 = vpop.permute.xlu0 %306 }
  0xc2   : > { %v305_v61 = vadd.f32 %v303_v50, %v296_v57  ;;  %v316_v62 = vmul.f32 %v831_v56, %v309_v59  ;;  %v304_v63 = vadd.f32 %v302_v51, %v295_v58  ;;  %v315_v0 = vmul.f32 %v831_v56, %v307_v60  ;;  %v618_v57 = vld [vmem:[#allocation3 + $0x90] sm:$0xff]  ;;  %v619_v58 = vld [vmem:[#allocation3 + $0x98] sm:$0xff]  ;;  %v621_v60 = vld [vmem:[#allocation3 + $0xa8] sm:$0xff] }
  0xc3   : > { %v1005_v56 = vpack.c.bf16 %v617_v54, %v616_v53  ;;  %v1009_v59 = vpack.c.bf16 %v619_v58, %v618_v57 }
  0xc4   : > { %v318_v9 = vadd.f32 %v316_v62, %v305_v61  ;;  %v317_v10 = vadd.f32 %v315_v0, %v304_v63  ;;  %v622_v63 = vld [vmem:[#allocation3 + $0xb0] sm:$0xff]  ;;  %v623_v0 = vld [vmem:[#allocation3 + $0xb8] sm:$0xff] }
  0xc5   : > { %v324_v5 = vpop.permute.xlu1 %323  ;;  %v322_v6 = vpop.permute.xlu0 %321  ;;  %1006 = vmatprep.subr.bf16.mxu1 %v1005_v56  ;;  %v1017_v3 = vpack.c.bf16 %v623_v0, %v622_v63 }
  0xc6   : > { %v332_v11 = vmul.f32 %v833_v4, %v324_v5  ;;  %v331_v12 = vmul.f32 %v833_v4, %v322_v6  ;;  %1008 = vmatpush3.bf16.msra.mxu1 %v1005_v56  ;;  %v624_v4 = vld [vmem:[#allocation3 + $0xc0] sm:$0xff]  ;;  %v625_v5 = vld [vmem:[#allocation3 + $0xc8] sm:$0xff] }
  0xc7   : > { %1010 = vmatprep.subr.bf16.mxu1 %v1009_v59  ;;  %v1021_v6 = vpack.c.bf16 %v625_v5, %v624_v4  ;;  %v858_v4 = vld [vmem:[%s1486_s2 + $0x1] ss:$0 sm:$0xff] }
  0xc8   : > { %v334_v14 = vadd.f32 %v332_v11, %v318_v9  ;;  %v333_v15 = vadd.f32 %v331_v12, %v317_v10  ;;  %v628_v9 = vld [vmem:[#allocation3 + $0xe0] sm:$0xff]  ;;  %v629_v11 = vld [vmem:[#allocation3 + $0xe8] sm:$0xff] }
  0xc9   : > { %v347_v16 = vpop.permute.xlu1 %346  ;;  %v345_v17 = vpop.permute.xlu0 %344 }
  0xca   : > { %v343_v18 = vadd.f32 %v341_v7, %v334_v14  ;;  %v354_v19 = vmul.f32 %v837_v13, %v347_v16  ;;  %v342_v20 = vadd.f32 %v340_v8, %v333_v15  ;;  %v353_v21 = vmul.f32 %v837_v13, %v345_v17  ;;  %1012 = vmatpush3.bf16.msra.mxu1 %v1009_v59  ;;  %v626_v7 = vld [vmem:[#allocation3 + $0xd0] sm:$0xff]  ;;  %v627_v8 = vld [vmem:[#allocation3 + $0xd8] sm:$0xff] }
  0xcb   : > { %v1025_v10 = vpack.c.bf16 %v627_v8, %v626_v7  ;;  %v1029_v13 = vpack.c.bf16 %v629_v11, %v628_v9  ;;  %v630_v14 = vld [vmem:[#allocation3 + $0xf0] sm:$0xff]  ;;  %v631_v15 = vld [vmem:[#allocation3 + $0xf8] sm:$0xff] }
  0xcc   : > { %v356_v23 = vadd.f32 %v354_v19, %v343_v18  ;;  %v355_v24 = vadd.f32 %v353_v21, %v342_v20  ;;  %v1033_v17 = vpack.c.bf16 %v631_v15, %v630_v14  ;;  %v841_v19 = vld [vmem:[%s1485_s1 + $0xc] ss:$0 sm:$0xff]  ;;  %v843_v20 = vld [vmem:[%s1485_s1 + $0xd] ss:$0 sm:$0xff]  ;;  %v857_v59 = vld [vmem:[%s1485_s1 + $0x16] ss:$0 sm:$0xff] }
  0xce   : > { %v362_v25 = vadd.f32 %v838_v22, %v355_v24  ;;  %v363_v26 = vadd.f32 %v838_v22, %v356_v23  ;;  %v845_v24 = vld [vmem:[%s1485_s1 + $0xe] ss:$0 sm:$0xff] }
  0xd0   : > { %v364_v27 = vadd.f32 3.0, %v362_v25  ;;  %v365_v28 = vadd.f32 3.0, %v363_v26 }
  0xd2   : > { %v366_v29 = vmax.f32 %v364_v27, 0.0  ;;  %v367_v30 = vmax.f32 %v365_v28, 0.0  ;;  %v847_v27 = vld [vmem:[%s1485_s1 + $0x10] ss:$0 sm:$0xff] }
  0xd4   : > { %v368_v31 = vmin.f32 %v366_v29, 6.0  ;;  %v369_v32 = vmin.f32 %v367_v30, 6.0 }
  0xd6   : > { %v370_v33 = vmul.f32 %v368_v31, %v362_v25  ;;  %v371_v34 = vmul.f32 %v369_v32, %v363_v26 }
  0xd8   : > { %v372_v35 = vmul.f32 0.16666667, %v370_v33  ;;  %v373_v36 = vmul.f32 0.16666667, %v371_v34  ;;  %v849_v34 = vld [vmem:[%s1485_s1 + $0x11] ss:$0 sm:$0xff] }
  0xda   : > { %935 = vmatprep.mubr.f32.mxu0 %v372_v35 }
  0xdb   : > { %936 = vmatmul.mubr.f32.vlgmr.msra.gmra.mrb[0].mxu0 %v373_v36 }
 0x1ae   : > { %v937_v38 = vpop.f32.mrb[0].mxu0 }
 0x1af   : > { %v467_v39 = vadd.f32 %v937_v38, %v839_v37  ;;  %v461_v40 = vpop.f32.mrb[1].mxu0 }
 0x1b0   : > { %v462_v41 = vadd.f32 %v839_v37, %v461_v40 }
 0x1b1   : > { %v471_v42 = vadd.f32 3.0, %v467_v39 }
 0x1b2   : > { %v470_v43 = vadd.f32 3.0, %v462_v41 }
 0x1b3   : > { %v473_v44 = vmax.f32 %v471_v42, 0.0 }
 0x1b4   : > { %v472_v45 = vmax.f32 %v470_v43, 0.0 }
 0x1b5   : > { %v475_v46 = vmin.f32 %v473_v44, 6.0 }
 0x1b6   : > { %v474_v47 = vmin.f32 %v472_v45, 6.0  ;;  %v853_v45 = vld [vmem:[%s1485_s1 + $0x14] ss:$0 sm:$0xff] }
 0x1b7   : > { %v477_v48 = vmul.f32 %v475_v46, %v467_v39  ;;  %v851_v39 = vld [vmem:[%s1485_s1 + $0x12] ss:$0 sm:$0xff] }
 0x1b8   : > { %v476_v49 = vmul.f32 %v474_v47, %v462_v41 }
 0x1b9   : > { %v479_v50 = vmul.f32 0.16666667, %v477_v48 }
 0x1ba   : > { %v478_v51 = vmul.f32 0.16666667, %v476_v49 }
 0x1bb   : > { %v1373_v52 = vadd.f32 %v479_v50, %v1317_v2  ;;  %v620_v2 = vld [vmem:[#allocation3 + $0xa0] sm:$0xff]  ;;  %v855_v50 = vld [vmem:[%s1485_s1 + $0x15] ss:$0 sm:$0xff] }
 0x1bc   : > { %v1376_v55 = vadd.f32 %v478_v51, %v1315_v1  ;;  %v1013_v61 = vpack.c.bf16 %v621_v60, %v620_v2 }
 0x1bd   : > { %483 = vst [vmem:[#allocation2 + $0x9] sm:$0xff] %v1373_v52  ;;  %526 = vrot.lane.b32.xlu1 %v1373_v52, %s1194_s11  ;;  %v544_v41 = vmul.f32 %v849_v34, %v1373_v52 }
 0x1be   : > { %482 = vst [vmem:[#allocation2 + $0x1] sm:$0xff] %v1376_v55  ;;  %1014 = vmatprep.subr.bf16.mxu1 %v1013_v61  ;;  %v543_v46 = vmul.f32 %v849_v34, %v1376_v55 }
 0x1bf   : > { %1016 = vmatpush3.bf16.msra.mxu1 %v1013_v61 }
 0x1c0   : > { %1018 = vmatprep.subr.bf16.mxu1 %v1017_v3 }
 0x1c3   : > { %1020 = vmatpush3.bf16.msra.mxu1 %v1017_v3 }
 0x1c4   : > { %1022 = vmatprep.subr.bf16.mxu1 %v1021_v6  ;;  %v561_v12 = vld [vmem:[#allocation2 + $0xa] sm:$0xff] }
 0x1c5   : > { %v484_v1 = vld [vmem:[#allocation2] sm:$0xff]  ;;  %v485_v62 = vld [vmem:[#allocation2 + $0x8] sm:$0xff]  ;;  %v582_v2 = vmul.f32 %v855_v50, %v561_v12 }
 0x1c6   : > { %486 = vrot.lane.b32.xlu0 %v484_v1, %s1194_s11  ;;  %488 = vrot.lane.b32.xlu1 %v485_v62, %s1194_s11  ;;  %v560_v16 = vld [vmem:[#allocation2 + $0x2] sm:$0xff]  ;;  %v506_v25 = vmul.f32 %v843_v20, %v485_v62  ;;  %v505_v30 = vmul.f32 %v843_v20, %v484_v1 }
 0x1c7   : > { %1024 = vmatpush3.bf16.msra.mxu1 %v1021_v6  ;;  %v581_v5 = vmul.f32 %v855_v50, %v560_v16 }
 0x1c8   : > { %1026 = vmatprep.subr.bf16.mxu1 %v1025_v10 }
 0x1ca   : > { %509 = vrot.lane.b32.xlu0 %v484_v1, %s1193_s30  ;;  %511 = vrot.lane.b32.xlu1 %v485_v62, %s1193_s30 }
 0x1cb   : > { %1028 = vmatpush3.bf16.msra.mxu1 %v1025_v10 }
 0x1cc   : > { %1030 = vmatprep.subr.bf16.mxu1 %v1029_v13 }
 0x1ce   : > { %524 = vrot.lane.b32.xlu0 %v1376_v55, %s1194_s11  ;;  %549 = vrot.lane.b32.xlu1 %v1373_v52, %s1193_s30 }
 0x1cf   : > { %1032 = vmatpush3.bf16.msra.mxu1 %v1029_v13 }
 0x1d0   : > { %1034 = vmatprep.subr.bf16.mxu1 %v1033_v17 }
 0x1d2   : > { %547 = vrot.lane.b32.xlu0 %v1376_v55, %s1193_s30  ;;  %564 = vrot.lane.b32.xlu1 %v561_v12, %s1194_s11 }
 0x1d3   : > { %1036 = vmatpush3.bf16.msra.mxu1 %v1033_v17 }
 0x1d6   : > { %562 = vrot.lane.b32.xlu0 %v560_v16, %s1194_s11  ;;  %587 = vrot.lane.b32.xlu1 %v561_v12, %s1193_s30 }
 0x1da   : > { %585 = vrot.lane.b32.xlu0 %v560_v16, %s1193_s30  ;;  %v859_v16 = vld [vmem:[%s1488_s4 + $0x1] ss:$0 sm:$0xff] }
 0x22f   : > { %v527_v18 = vpop.permute.xlu1 %526 }
 0x230   : > { %v535_v35 = vmul.f32 %v847_v27, %v527_v18 }
 0x238   : > { %v487_v21 = vpop.permute.xlu0 %486  ;;  %v489_v22 = vpop.permute.xlu1 %488 }
 0x239   : > { %v497_v23 = vmul.f32 %v841_v19, %v489_v22  ;;  %v496_v26 = vmul.f32 %v841_v19, %v487_v21 }
 0x23b   : > { %v508_v31 = vadd.f32 %v506_v25, %v497_v23  ;;  %v507_v36 = vadd.f32 %v505_v30, %v496_v26 }
 0x23c   : > { %v510_v28 = vpop.permute.xlu0 %509  ;;  %v512_v29 = vpop.permute.xlu1 %511 }
 0x23d   : > { %v518_v32 = vmul.f32 %v845_v24, %v510_v28  ;;  %v519_v33 = vmul.f32 %v845_v24, %v512_v29 }
 0x23f   : > { %v521_v37 = vadd.f32 %v519_v33, %v508_v31  ;;  %v520_v42 = vadd.f32 %v518_v32, %v507_v36 }
 0x240   : > { %v525_v38 = vpop.permute.xlu0 %524  ;;  %v550_v40 = vpop.permute.xlu1 %549 }
 0x241   : > { %v537_v43 = vadd.f32 %v535_v35, %v521_v37  ;;  %v534_v44 = vmul.f32 %v847_v27, %v525_v38  ;;  %v557_v49 = vmul.f32 %v851_v39, %v550_v40 }
 0x243   : > { %v536_v47 = vadd.f32 %v534_v44, %v520_v42  ;;  %v546_v48 = vadd.f32 %v544_v41, %v537_v43 }
 0x244   : > { %v548_v51 = vpop.permute.xlu0 %547  ;;  %v565_v53 = vpop.permute.xlu1 %564 }
 0x245   : > { %v559_v54 = vadd.f32 %v557_v49, %v546_v48  ;;  %v545_v56 = vadd.f32 %v543_v46, %v536_v47  ;;  %v556_v57 = vmul.f32 %v851_v39, %v548_v51  ;;  %v573_v58 = vmul.f32 %v853_v45, %v565_v53 }
 0x247   : > { %v575_v60 = vadd.f32 %v573_v58, %v559_v54  ;;  %v558_v62 = vadd.f32 %v556_v57, %v545_v56 }
 0x248   : > { %v563_v61 = vpop.permute.xlu0 %562  ;;  %v588_v1 = vpop.permute.xlu1 %587 }
 0x249   : > { %v572_v63 = vmul.f32 %v853_v45, %v563_v61  ;;  %v584_v0 = vadd.f32 %v582_v2, %v575_v60  ;;  %v595_v3 = vmul.f32 %v857_v59, %v588_v1 }
 0x24b   : > { %v574_v6 = vadd.f32 %v572_v63, %v558_v62  ;;  %v597_v7 = vadd.f32 %v595_v3, %v584_v0 }
 0x24c   : > { %v586_v8 = vpop.permute.xlu0 %585 }
 0x24d   : > { %v583_v9 = vadd.f32 %v581_v5, %v574_v6  ;;  %v594_v10 = vmul.f32 %v857_v59, %v586_v8  ;;  %v604_v11 = vadd.f32 %v858_v4, %v597_v7 }
 0x24f   : > { %v596_v13 = vadd.f32 %v594_v10, %v583_v9  ;;  %v606_v12 = vadd.f32 3.0, %v604_v11 }
 0x251   : > { %v603_v14 = vadd.f32 %v858_v4, %v596_v13  ;;  %v608_v15 = vmax.f32 %v606_v12, 0.0 }
 0x253   : > { %v605_v17 = vadd.f32 3.0, %v603_v14  ;;  %v610_v18 = vmin.f32 %v608_v15, 6.0 }
 0x255   : > { %v607_v19 = vmax.f32 %v605_v17, 0.0  ;;  %v612_v21 = vmul.f32 %v610_v18, %v604_v11 }
 0x257   : > { %v609_v20 = vmin.f32 %v607_v19, 6.0  ;;  %v614_v24 = vmul.f32 0.16666667, %v612_v21 }
 0x259   : > { %v611_v22 = vmul.f32 %v609_v20, %v603_v14 }
 0x25b   : > { %v613_v23 = vmul.f32 0.16666667, %v611_v22 }
 0x25d   : > { %970 = vmatprep.mubr.f32.mxu1 %v613_v23 }
 0x25e   : > { %971 = vmatmul.mubr.f32.vlgmr.msra.gmra.mrb[0].mxu1 %v614_v24 }
 0x331   : > { %v972_v25 = vpop.f32.mrb[0].mxu1 }
 0x332   : > { %v709_v26 = vadd.f32 %v972_v25, %v859_v16  ;;  %v703_v27 = vpop.f32.mrb[1].mxu1 }
 0x333   : > { %v704_v28 = vadd.f32 %v859_v16, %v703_v27 }
 0x334   : > { %v713_v29 = vadd.f32 3.0, %v709_v26 }
 0x335   : > { %v712_v30 = vadd.f32 3.0, %v704_v28 }
 0x336   : > { %v715_v31 = vmax.f32 %v713_v29, 0.0 }
 0x337   : > { %v714_v32 = vmax.f32 %v712_v30, 0.0 }
 0x338   : > { %v717_v33 = vmin.f32 %v715_v31, 6.0 }
 0x339   : > { %v716_v34 = vmin.f32 %v714_v32, 6.0 }
 0x33a   : > { %v719_v35 = vmul.f32 %v717_v33, %v709_v26 }
 0x33b   : > { %v718_v36 = vmul.f32 %v716_v34, %v704_v28 }
 0x33c   : > { %v721_v37 = vmul.f32 0.16666667, %v719_v35 }
 0x33d   : > { %v720_v38 = vmul.f32 0.16666667, %v718_v36 }
 0x33e   : > { %v723_v39 = vadd.f32 %v721_v37, %v1373_v52 }
 0x33f   : > { %v722_v40 = vadd.f32 %v720_v38, %v1376_v55 }
 0x340   : > { %725 = vst [vmem:[%s232_s14 + $0x8] sm:$0xff] %v723_v39 }
 0x341   : > { %724 = vst [vmem:[%s232_s14] sm:$0xff] %v722_v40 }
 0x342   : > { %1134 = shalt.err (!%p1131_p7)
}
 0x343   : > { %s1135_s10 = scalar_lea.hbm %s1440_s25, 256  ;;  %s1139_s12 = scalar_lea.hbm %s1489_s5, 512 }
 0x344   : > { %p1136_p8 = scmp.ne.s32.totalorder %s1440_s25, %s1135_s10  ;;  %p1140_p1 = scmp.lt.u32.totalorder %s1440_s25, %s1489_s5 }
 0x345   : > { %p1141_p0 = scmp.lt.u32.totalorder %s1139_s12, %s1135_s10  ;;  %p1143_p6 = scmp.lt.u32.totalorder %s1135_s10, %s1440_s25 }
 0x346   : > { %p1137_p11 = pnand %p1136_p8, %p1500_p9 }
 0x347   : > { %p1142_p5 = por %p1141_p0, %p1140_p1 }
 0x348   : > { %p1138_p13 = pneg %p1137_p11 }
 0x349   : > { %p1144_p10 = por %p1143_p6, %p1142_p5 }
 0x34b   : > { %p1145_p12 = pnand %p1144_p10, %p1138_p13 }
 0x34d   : > { %1148 = shalt.err (!%p1145_p12)
}
 0x34e   : > { %s1196_s16 = smov 128  }
 0x34f   : > { %1041 = dma.vmem_to_hbm [thread:$0]  (%p1500_p9), %s1434_s15, 256, %s1440_s25, %s1442_s26, %s1196_s16, %s1196_s16, %s1194_s11  }
 0x350 PF: > { %p1053_p2 = scmp.ge.s32.totalorder %s1187_s21, 2  ;;  %s755_s17 = sand.u32 1, %s1175_s18  }
 0x351   : > { %p1501_p3 = scmp.ne.s32.totalorder %s1494_s29, 0  ;;  %s756_s23 = scalar_lea.sflag [#allocation5], %s755_s17 }
 0x353   : > { %p1048_p4 = pnand %p1053_p2, %p1501_p3 }
 0x355   : > { %1170 = dma.done.wait (!%p1048_p4), %s756_s23, 256  }
 0x356   : > { %1172 = vsyncadd (!%p1048_p4), %s756_s23, 4294967040  ;;  %p16_p7 = scmp.ge.s32.totalorder %s1252_s24, 4   ;;  %s1502_s18 = smov %s1179_s19 }
 0x357   : > { %s1503_s19 = smov %s1183_s20  ;;  %s1504_s20 = smov %s1263_s27 }
 0x358   : > { %s1505_s21 = smov %s1252_s24  ;;  %18 = sbr.rel (!%p16_p7) target bundleno = 4 (0x4), region = 86 }
 0x35f   :  { %761 = vsyncpa [#allocation4], 1 }
 0x360   :  { %763 = vsyncpa [#allocation4 + $0x1], 1 }
 0x361   :  { %764 = vsyncpa [#allocation5], 1 }
 0x362   :  { %766 = vsyncpa [#allocation5 + $0x1], 1 }

</bundles_post_ra>
